<compile_context>
chip_gen: v6e
topology: v6e:2x2x1
jax: 0.10.0
libtpu: 0.0.40
codegen_flags: <defaults>
</compile_context>

<pallas_src>
import functools

import jax
import jax.numpy as jnp
from jax import lax
from jax.experimental import pallas as pl
from jax.experimental.pallas import tpu as pltpu

EPS = 1e-5  # torch.nn.LayerNorm default


def _cnn_ln_kernel(x_ref, g_ref, b_ref, o_ref, *, t_chunk):
    # x_ref/o_ref: (r_blk, F, t_blk)   g_ref/b_ref: (1, F, 1)
    f = x_ref.shape[1]
    t_blk = x_ref.shape[2]
    inv_f = jnp.float32(1.0 / f)
    eps = jnp.float32(EPS)

    # gamma/beta loaded + cast ONCE per invocation (hoisted above the chunk loop).
    g = g_ref[...].astype(jnp.float32)   # (1, F, 1)
    b = b_ref[...].astype(jnp.float32)

    def _normalize(x_stats, x_norm):
        # One-pass stats in f32; reduction over F is a sublane (XLU) reduce.
        mean = jnp.sum(x_stats, axis=1, keepdims=True) * inv_f          # (R,1,tc)
        msq = jnp.sum(x_stats * x_stats, axis=1, keepdims=True) * inv_f
        var = jnp.maximum(msq - mean * mean, 0.0)                        # clamp: 1-pass safety
        inv = lax.rsqrt(var + eps)                                       # EUP slot
        return (x_norm - mean) * inv * g + b

    n_full = t_blk // t_chunk
    rem = t_blk - n_full * t_chunk

    if n_full > 0:
        def body(c, carry):
            t0 = pl.multiple_of(c * t_chunk, 128)
            sl = pl.ds(t0, t_chunk)
            xs = x_ref[:, :, sl].astype(jnp.float32)
            # Re-read the chunk from VMEM for the normalize pass: trades a cheap
            # vld for keeping the whole f32 chunk live in vregs across the
            # stats reduction (avoids spill stores through the scarce vst slot).
            xn = x_ref[:, :, sl].astype(jnp.float32)
            o_ref[:, :, sl] = _normalize(xs, xn).astype(o_ref.dtype)
            return carry

        lax.fori_loop(0, n_full, body, 0, unroll=True)

    if rem > 0:  # static tail (start is a multiple of t_chunk, hence of 128)
        start = n_full * t_chunk
        xs = x_ref[:, :, start:start + rem].astype(jnp.float32)
        o_ref[:, :, start:start + rem] = _normalize(xs, xs).astype(o_ref.dtype)


def cnn_layer_norm(x, gamma, beta, *, target_block_bytes=None,
                   t_tile_max=2048, min_grid_steps=8):
    """x: (B, C, F, T). gamma, beta: (F,). Returns (B, C, F, T)."""
    B, C, F, T = x.shape
    rows = B * C
    x3 = x.reshape(rows, F, T)                      # merging leading dims is free
    itemsize = jnp.dtype(x.dtype).itemsize

    # --- per-generation sizing -------------------------------------------
    try:
        info = pltpu.get_tpu_info()
        vmem_cap = int(getattr(info, "vmem_capacity_bytes", 64 << 20))
    except Exception:
        vmem_cap = 64 << 20                          # conservative fallback (v7x)
    if target_block_bytes is None:
        # ~4 MiB blocks on 128 MiB-VMEM parts (v5e/v6e), ~2 MiB on v7x (64 MiB).
        target_block_bytes = (4 << 20) if vmem_cap >= (100 << 20) else (2 << 20)

    # --- tile selection ---------------------------------------------------
    # Lane (time) tile: full extent when it fits, else a large multiple of 128.
    t_blk = T if T <= t_tile_max else t_tile_max
    bytes_per_row = F * t_blk * itemsize
    r_blk = max(1, min(rows, pl.cdiv(target_block_bytes, bytes_per_row)))

    # Keep the grid populated (megacore sharding + pipeline depth) for large
    # problems, but never shrink blocks below ~2 MiB to do so.
    t_steps = pl.cdiv(T, t_blk)
    while (pl.cdiv(rows, r_blk) * t_steps < min_grid_steps
           and r_blk > 1
           and r_blk * bytes_per_row > (2 << 20)):
        r_blk = pl.cdiv(r_blk, 2)

    grid = (pl.cdiv(rows, r_blk), t_steps)

    # --- VMEM budget: double-buffered in+out (= 4x block) + headroom -------
    blk_bytes = r_blk * bytes_per_row
    vmem_limit = int(min(max(4 * blk_bytes + (8 << 20), 32 << 20),
                         max(32 << 20, vmem_cap // 2)))

    # In-kernel lane chunk bounding the live f32 working set per pass.
    t_chunk = 512

    g3 = gamma.reshape(1, F, 1)
    b3 = beta.reshape(1, F, 1)

    kernel = functools.partial(_cnn_ln_kernel, t_chunk=t_chunk)

    cost = pl.CostEstimate(
        flops=int(9 * rows * F * T),
        transcendentals=int(rows * T),
        bytes_accessed=int(2 * rows * F * T * itemsize + 2 * F * 4),
    )

    out3 = pl.pallas_call(
        kernel,
        out_shape=jax.ShapeDtypeStruct((rows, F, T), x.dtype),
        grid_spec=pltpu.PrefetchScalarGridSpec(
            num_scalar_prefetch=0,
            grid=grid,
            in_specs=[
                pl.BlockSpec((r_blk, F, t_blk), lambda r, t: (r, 0, t)),
                pl.BlockSpec((1, F, 1), lambda r, t: (0, 0, 0)),  # const idx: no re-DMA
                pl.BlockSpec((1, F, 1), lambda r, t: (0, 0, 0)),
            ],
            out_specs=pl.BlockSpec((r_blk, F, t_blk), lambda r, t: (r, 0, t)),
        ),
        compiler_params=pltpu.CompilerParams(
            dimension_semantics=("parallel", "parallel"),
            vmem_limit_bytes=vmem_limit,
        ),
        cost_estimate=cost,
    )(x3, g3, b3)

    return out3.reshape(B, C, F, T)


def _reference(x, gamma, beta):
    xt = jnp.transpose(x, (0, 1, 3, 2)).astype(jnp.float32)
    mean = jnp.mean(xt, axis=-1, keepdims=True)
    var = jnp.mean((xt - mean) ** 2, axis=-1, keepdims=True)
    y = (xt - mean) / jnp.sqrt(var + EPS) * gamma + beta
    return jnp.transpose(y, (0, 1, 3, 2)).astype(x.dtype)


if __name__ == "__main__":
    key = jax.random.PRNGKey(0)
    k1, k2, k3 = jax.random.split(key, 3)

    # Test 1: small canonical shape (batch=2, channels=4, n_feats=16, time=16).
    B, C, F, T = 2, 4, 16, 16
    x = jax.random.normal(k1, (B, C, F, T), dtype=jnp.float32)
    gamma = jnp.ones((F,), jnp.float32) + 0.01 * jnp.arange(F, dtype=jnp.float32)
    beta = 0.005 * jnp.arange(F, dtype=jnp.float32)

    out = jax.block_until_ready(cnn_layer_norm(x, gamma, beta))
    ref = _reference(x, gamma, beta)
    assert out.shape == (B, C, F, T)
    assert jnp.allclose(out, ref, atol=2e-5, rtol=2e-5), "mismatch vs reference (test 1)"

    # Test 2: non-divisible rows and T (exercises cdiv grid + masked tails).
    B2, C2, F2, T2 = 2, 3, 16, 160
    x2 = jax.random.normal(k2, (B2, C2, F2, T2), dtype=jnp.float32)
    out2 = jax.block_until_ready(cnn_layer_norm(x2, gamma, beta))
    ref2 = _reference(x2, gamma, beta)
    assert out2.shape == (B2, C2, F2, T2)
    assert jnp.allclose(out2, ref2, atol=2e-5, rtol=2e-5), "mismatch vs reference (test 2)"

    # Test 3: long time axis (exercises the T-grid split, the in-kernel 512-lane
    # chunk loop, and a padded final T tile).
    B3, C3, F3, T3 = 1, 2, 16, 2304
    x3 = jax.random.normal(k3, (B3, C3, F3, T3), dtype=jnp.float32)
    out3 = jax.block_until_ready(cnn_layer_norm(x3, gamma, beta))
    ref3 = _reference(x3, gamma, beta)
    assert out3.shape == (B3, C3, F3, T3)
    assert jnp.allclose(out3, ref3, atol=2e-5, rtol=2e-5), "mismatch vs reference (test 3)"

    print("KERNEL_OK")
</pallas_src>

<mosaic_0001>
module attributes {stable_mosaic.version = 11 : i64} {
  func.func @_cnn_ln_kernel(%arg0: i32, %arg1: i32, %arg2: memref<8x16x16xf32, #tpu.memory_space<vmem>>, %arg3: memref<1x16x1xf32, #tpu.memory_space<vmem>>, %arg4: memref<1x16x1xf32, #tpu.memory_space<vmem>>, %arg5: memref<8x16x16xf32, #tpu.memory_space<vmem>>) attributes {dimension_semantics = [#tpu.dimension_semantics<parallel>, #tpu.dimension_semantics<parallel>], iteration_bounds = array<i64: 1, 1>, scalar_prefetch = 0 : i64, scratch_operands = 0 : i64, tpu.core_type = #tpu.core_type<tc>, window_params = [{transform_indices = @transform_0, window_bounds = array<i64: 8, 16, 16>}, {pipeline_mode = #tpu.pipeline_mode<synchronous>, transform_indices = @transform_1, window_bounds = array<i64: 1, 16, 1>}, {pipeline_mode = #tpu.pipeline_mode<synchronous>, transform_indices = @transform_2, window_bounds = array<i64: 1, 16, 1>}, {transform_indices = @transform_3, window_bounds = array<i64: 8, 16, 16>}]} {
    %c0 = arith.constant 0 : index
    %c0_0 = arith.constant 0 : index
    %c0_1 = arith.constant 0 : index
    %0 = vector.load %arg3[%c0, %c0_0, %c0_1] : memref<1x16x1xf32, #tpu.memory_space<vmem>>, vector<1x16x1xf32>
    %c0_2 = arith.constant 0 : index
    %c0_3 = arith.constant 0 : index
    %c0_4 = arith.constant 0 : index
    %1 = vector.load %arg4[%c0_2, %c0_3, %c0_4] : memref<1x16x1xf32, #tpu.memory_space<vmem>>, vector<1x16x1xf32>
    %c0_5 = arith.constant 0 : index
    %c0_6 = arith.constant 0 : index
    %c0_7 = arith.constant 0 : index
    %2 = vector.load %arg2[%c0_5, %c0_6, %c0_7] : memref<8x16x16xf32, #tpu.memory_space<vmem>>, vector<8x16x16xf32>
    %cst = arith.constant dense<0.000000e+00> : vector<8x16xf32>
    %3 = vector.multi_reduction <add>, %2, %cst [1] : vector<8x16x16xf32> to vector<8x16xf32>
    %4 = vector.shape_cast %3 : vector<8x16xf32> to vector<8x1x16xf32>
    %cst_8 = arith.constant 6.250000e-02 : f32
    %5 = vector.broadcast %cst_8 : f32 to vector<8x1x16xf32>
    %6 = arith.mulf %4, %5 : vector<8x1x16xf32>
    %7 = arith.mulf %2, %2 : vector<8x16x16xf32>
    %cst_9 = arith.constant dense<0.000000e+00> : vector<8x16xf32>
    %8 = vector.multi_reduction <add>, %7, %cst_9 [1] : vector<8x16x16xf32> to vector<8x16xf32>
    %9 = vector.shape_cast %8 : vector<8x16xf32> to vector<8x1x16xf32>
    %cst_10 = arith.constant 6.250000e-02 : f32
    %10 = vector.broadcast %cst_10 : f32 to vector<8x1x16xf32>
    %11 = arith.mulf %9, %10 : vector<8x1x16xf32>
    %12 = arith.mulf %6, %6 : vector<8x1x16xf32>
    %13 = arith.subf %11, %12 : vector<8x1x16xf32>
    %cst_11 = arith.constant 0.000000e+00 : f32
    %14 = vector.broadcast %cst_11 : f32 to vector<8x1x16xf32>
    %15 = arith.maximumf %13, %14 : vector<8x1x16xf32>
    %cst_12 = arith.constant 9.99999974E-6 : f32
    %16 = vector.broadcast %cst_12 : f32 to vector<8x1x16xf32>
    %17 = arith.addf %15, %16 : vector<8x1x16xf32>
    %18 = math.rsqrt %17 : vector<8x1x16xf32>
    %19 = vector.broadcast %6 : vector<8x1x16xf32> to vector<8x16x16xf32>
    %20 = arith.subf %2, %19 : vector<8x16x16xf32>
    %21 = vector.broadcast %18 : vector<8x1x16xf32> to vector<8x16x16xf32>
    %22 = arith.mulf %20, %21 : vector<8x16x16xf32>
    %23 = vector.broadcast %0 : vector<1x16x1xf32> to vector<8x16x16xf32>
    %24 = arith.mulf %22, %23 : vector<8x16x16xf32>
    %25 = vector.broadcast %1 : vector<1x16x1xf32> to vector<8x16x16xf32>
    %26 = arith.addf %24, %25 : vector<8x16x16xf32>
    %c0_13 = arith.constant 0 : index
    %c0_14 = arith.constant 0 : index
    %c0_15 = arith.constant 0 : index
    %27 = vector.load %arg5[%c0_13, %c0_14, %c0_15] : memref<8x16x16xf32, #tpu.memory_space<vmem>>, vector<8x16x16xf32>
    tpu.vector_store %arg5[%c0_13, %c0_14, %c0_15], %26 {strides = array<i32>} : memref<8x16x16xf32, #tpu.memory_space<vmem>>, vector<8x16x16xf32>,
    return
  }
  func.func @transform_0(%arg0: i32, %arg1: i32) -> (i32, i32, i32) {
    %c0_i32 = arith.constant 0 : i32
    %c0_i32_0 = arith.constant 0 : i32
    return %arg0, %c0_i32, %arg1 : i32, i32, i32
  }
  func.func @transform_1(%arg0: i32, %arg1: i32) -> (i32, i32, i32) {
    %c0_i32 = arith.constant 0 : i32
    %c0_i32_0 = arith.constant 0 : i32
    %c0_i32_1 = arith.constant 0 : i32
    %c0_i32_2 = arith.constant 0 : i32
    return %c0_i32, %c0_i32_0, %c0_i32_1 : i32, i32, i32
  }
  func.func @transform_2(%arg0: i32, %arg1: i32) -> (i32, i32, i32) {
    %c0_i32 = arith.constant 0 : i32
    %c0_i32_0 = arith.constant 0 : i32
    %c0_i32_1 = arith.constant 0 : i32
    %c0_i32_2 = arith.constant 0 : i32
    return %c0_i32, %c0_i32_0, %c0_i32_1 : i32, i32, i32
  }
  func.func @transform_3(%arg0: i32, %arg1: i32) -> (i32, i32, i32) {
    %c0_i32 = arith.constant 0 : i32
    %c0_i32_0 = arith.constant 0 : i32
    return %arg0, %c0_i32, %arg1 : i32, i32, i32
  }
}

</mosaic_0001>

<bundles_post_ra>
// kernel: tpu_custom_call.1
= control target key start
LH: loop header
LB: loop body
LE: loop exit
PB: predicated region body
PF: predicated region fallthrough
CT: control target
= control target key end

     0   :  { %8 = vsyncpa [#allocation3], 0  ;;  %s707_s0 = inlined_call_operand.hbm [shape: f32[8,16,16], index: 0, kind: input, shape index: {}]   ;;  %s708_s1 = inlined_call_operand.vmem [shape: f32[1,16,1], index: 1, kind: input, shape index: {}]   ;;  %s709_s2 = inlined_call_operand.vmem [shape: f32[1,16,1], index: 2, kind: input, shape index: {}]   ;;  %s710_s3 = inlined_call_operand.hbm [shape: f32[8,16,16], index: 3, kind: output, shape index: {}]  }
   0x1   :  { %9 = vsyncpa [#allocation4], 0  ;;  %s450_s12 = smov [#allocation2]  }
   0x2   :  { %s15_s13 = sshll.u32 %s450_s12, 4  ;;  %s16_s13 = int_to_ptr.vmem [resolvable:$true] %s15_s13 }
   0x3   :  { %s414_s14 = scalar_lea.vmem %s16_s13, 2048  ;;  %p419_p1 = scmp.lt.s32.totalorder %s16_s13, %s16_s13 }
   0x4   :  { %p415_p0 = scmp.ne.s32.totalorder %s16_s13, %s414_s14  ;;  %p420_p2 = scmp.lt.s32.totalorder %s414_s14, %s414_s14 }
   0x6   :  { %p421_p3 = por %p420_p2, %p419_p1 }
   0x8   :  { %p422_p4 = pnand %p421_p3, %p415_p0 }
   0xa   :  { %425 = shalt.err (!%p422_p4)
}
   0xb   :  { %s451_s15 = smov 128   ;;  %s452_s16 = smov 8  }
   0xc   :  { %21 = dma.hbm_to_vmem [thread:$0]  %s707_s0, 2048, %s16_s13, [#allocation3], %s451_s15, %s451_s15, %s452_s16  }
   0xd   :  { %446 = dma.done.wait [#allocation3], 2048  }
   0xe   :  { %447 = vsyncadd [#allocation3], 4294965248  ;;  %v453_v0 = vmov 0   ;;  %v31_v1 = vld [vmem:[%s709_s2] sm:$0xff]  ;;  %v32_v3 = vld [vmem:[%s709_s2 + $0x8] sm:$0xff]  ;;  %vm49_vm0 = vcmask 130048  }
   0xf   :  { %389 = vset.pattern.permute.xlu1 %v453_v0  ;;  %388 = vset.pattern.permute.xlu0 %v453_v0  ;;  %v29_v2 = vld [vmem:[%s708_s1] sm:$0xff]  ;;  %v30_v4 = vld [vmem:[%s708_s1 + $0x8] sm:$0xff]  ;;  %v497_v7 = vld [vmem:[#allocation2 + $0x10] sm:$0xff]  ;;  %s454_s1 = smov [#allocation5]  }
  0x10   :  { %326 = vperm.xlu1 %389, %v31_v1   ;;  %300 = vperm.xlu0 %388, %v29_v2   ;;  %v493_v5 = vld [vmem:[#allocation2] sm:$0xff]  ;;  %v495_v6 = vld [vmem:[#allocation2 + $0x8] sm:$0xff]  ;;  %v499_v8 = vld [vmem:[#allocation2 + $0x18] sm:$0xff]  ;;  %v59_v16 = vsel %vm49_vm0, %v497_v7, 0.0  ;;  %v132_v47 = vmul.f32 %v497_v7, %v497_v7  ;;  %s371_s2 = sshll.u32 %s454_s1, 4  ;;  %s372_s2 = int_to_ptr.vmem [resolvable:$true] %s371_s2 }
  0x11   :  { %v501_v9 = vld [vmem:[#allocation2 + $0x20] sm:$0xff]  ;;  %v50_v10 = vsel %vm49_vm0, %v493_v5, 0.0  ;;  %v51_v11 = vsel %vm49_vm0, %v495_v6, 0.0  ;;  %v507_v12 = vld [vmem:[#allocation2 + $0x28] sm:$0xff]  ;;  %v509_v13 = vld [vmem:[#allocation2 + $0x30] sm:$0xff]  ;;  %v60_v17 = vsel %vm49_vm0, %v499_v8, 0.0  ;;  %v130_v38 = vmul.f32 %v493_v5, %v493_v5  ;;  %p431_p6 = scmp.lt.s32.totalorder %s372_s2, %s372_s2 }
  0x12   :  { %v511_v14 = vld [vmem:[#allocation2 + $0x38] sm:$0xff]  ;;  %v52_v15 = vadd.f32 %v51_v11, %v50_v10  ;;  %v68_v18 = vsel %vm49_vm0, %v501_v9, 0.0  ;;  %v69_v19 = vsel %vm49_vm0, %v507_v12, 0.0  ;;  %v77_v20 = vsel %vm49_vm0, %v509_v13, 0.0  ;;  %v525_v22 = vld [vmem:[#allocation2 + $0x40] sm:$0xff]  ;;  %v527_v23 = vld [vmem:[#allocation2 + $0x48] sm:$0xff] }
  0x13   :  { %v78_v21 = vsel %vm49_vm0, %v511_v14, 0.0  ;;  %v529_v24 = vld [vmem:[#allocation2 + $0x50] sm:$0xff]  ;;  %v531_v25 = vld [vmem:[#allocation2 + $0x58] sm:$0xff]  ;;  %v533_v26 = vadd.f32 %v60_v17, %v59_v16  ;;  %v535_v28 = vadd.f32 %v69_v19, %v68_v18  ;;  %v86_v30 = vsel %vm49_vm0, %v525_v22, 0.0  ;;  %v543_v32 = vld [vmem:[#allocation2 + $0x60] sm:$0xff]  ;;  %s426_s26 = scalar_lea.vmem %s372_s2, 2048 }
  0x14   :  { %331 = vperm.xlu1 %389, %v32_v3   ;;  %305 = vperm.xlu0 %388, %v30_v4   ;;  %v53_v27 = vrot.slane %v52_v15, 4  ;;  %v537_v29 = vadd.f32 %v78_v21, %v77_v20  ;;  %v87_v31 = vsel %vm49_vm0, %v527_v23, 0.0  ;;  %v95_v33 = vsel %vm49_vm0, %v529_v24, 0.0  ;;  %v549_v35 = vld [vmem:[#allocation2 + $0x68] sm:$0xff]  ;;  %v551_v36 = vld [vmem:[#allocation2 + $0x70] sm:$0xff]  ;;  %v558_v40 = vld [vmem:[#allocation2 + $0x78] sm:$0xff]  ;;  %p427_p5 = scmp.ne.s32.totalorder %s372_s2, %s426_s26  ;;  %p432_p7 = scmp.lt.s32.totalorder %s426_s26, %s426_s26 }
  0x15   :  { %v96_v34 = vsel %vm49_vm0, %v531_v25, 0.0  ;;  %v62_v37 = vrot.slane %v533_v26, 4  ;;  %v131_v39 = vmul.f32 %v495_v6, %v495_v6  ;;  %v71_v42 = vrot.slane %v535_v28, 4 }
  0x16   :  { %v560_v41 = vadd.f32 %v53_v27, %v52_v15  ;;  %v80_v43 = vrot.slane %v537_v29, 4  ;;  %v88_v44 = vadd.f32 %v87_v31, %v86_v30  ;;  %v97_v45 = vadd.f32 %v96_v34, %v95_v33  ;;  %p433_p8 = por %p432_p7, %p431_p6 }
  0x17   :  { %v104_v46 = vsel %vm49_vm0, %v543_v32, 0.0  ;;  %v133_v48 = vmul.f32 %v499_v8, %v499_v8  ;;  %v105_v49 = vsel %vm49_vm0, %v549_v35, 0.0  ;;  %v113_v50 = vsel %vm49_vm0, %v551_v36, 0.0 }
  0x18   :  { %v134_v51 = vmul.f32 %v501_v9, %v501_v9  ;;  %v135_v52 = vmul.f32 %v507_v12, %v507_v12  ;;  %v114_v53 = vsel %vm49_vm0, %v558_v40, 0.0  ;;  %v136_v54 = vmul.f32 %v509_v13, %v509_v13  ;;  %p434_p9 = pnand %p433_p8, %p427_p5 }
  0x19   :  { %v137_v55 = vmul.f32 %v511_v14, %v511_v14  ;;  %v138_v56 = vmul.f32 %v525_v22, %v525_v22  ;;  %v139_v57 = vmul.f32 %v527_v23, %v527_v23  ;;  %v140_v58 = vmul.f32 %v529_v24, %v529_v24 }
  0x1a   :  { %v146_v59 = vsel %vm49_vm0, %v130_v38, 0.0  ;;  %v147_v60 = vsel %vm49_vm0, %v131_v39, 0.0  ;;  %v141_v61 = vmul.f32 %v531_v25, %v531_v25  ;;  %v142_v62 = vmul.f32 %v543_v32, %v543_v32 }
  0x1b   :  { %v155_v63 = vsel %vm49_vm0, %v132_v47, 0.0  ;;  %v156_v0 = vsel %vm49_vm0, %v133_v48, 0.0  ;;  %v143_v1 = vmul.f32 %v549_v35, %v549_v35  ;;  %v144_v2 = vmul.f32 %v551_v36, %v551_v36 }
  0x1c   :  { %v164_v3 = vsel %vm49_vm0, %v134_v51, 0.0  ;;  %v165_v4 = vsel %vm49_vm0, %v135_v52, 0.0  ;;  %v145_v10 = vmul.f32 %v558_v40, %v558_v40  ;;  %v148_v11 = vadd.f32 %v147_v60, %v146_v59 }
  0x1d   :  { %v173_v15 = vsel %vm49_vm0, %v136_v54, 0.0  ;;  %v174_v16 = vsel %vm49_vm0, %v137_v55, 0.0  ;;  %v89_v17 = vrot.slane %v88_v44, 4  ;;  %v157_v18 = vadd.f32 %v156_v0, %v155_v63 }
  0x1e   :  { %v182_v19 = vsel %vm49_vm0, %v138_v56, 0.0  ;;  %v183_v20 = vsel %vm49_vm0, %v139_v57, 0.0  ;;  %v106_v21 = vadd.f32 %v105_v49, %v104_v46  ;;  %v166_v27 = vadd.f32 %v165_v4, %v164_v3 }
  0x1f   :  { %v191_v30 = vsel %vm49_vm0, %v140_v58, 0.0  ;;  %v192_v31 = vsel %vm49_vm0, %v141_v61, 0.0  ;;  %v115_v33 = vadd.f32 %v114_v53, %v113_v50  ;;  %v175_v34 = vadd.f32 %v174_v16, %v173_v15 }
  0x20   :  { %v200_v38 = vsel %vm49_vm0, %v142_v62, 0.0  ;;  %v201_v39 = vsel %vm49_vm0, %v143_v1, 0.0  ;;  %v149_v47 = vrot.slane %v148_v11, 4  ;;  %v184_v48 = vadd.f32 %v183_v20, %v182_v19 }
  0x21   :  { %v209_v51 = vsel %vm49_vm0, %v144_v2, 0.0  ;;  %v210_v52 = vsel %vm49_vm0, %v145_v10, 0.0  ;;  %v63_v54 = vadd.f32 %v62_v37, %v533_v26  ;;  %v98_v46 = vrot.slane %v97_v45, 4 }
  0x22   :  { %v158_v49 = vrot.slane %v157_v18, 4  ;;  %v193_v55 = vadd.f32 %v192_v31, %v191_v30  ;;  %v72_v56 = vadd.f32 %v71_v42, %v535_v28  ;;  %v107_v57 = vrot.slane %v106_v21, 4 }
  0x23   :  { %v167_v50 = vrot.slane %v166_v27, 4  ;;  %v202_v53 = vadd.f32 %v201_v39, %v200_v38  ;;  %v81_v58 = vadd.f32 %v80_v43, %v537_v29  ;;  %v116_v59 = vrot.slane %v115_v33, 4 }
  0x24   :  { %v176_v60 = vrot.slane %v175_v34, 4  ;;  %v211_v61 = vadd.f32 %v210_v52, %v209_v51  ;;  %v55_v62 = vrot.slane %v560_v41, 2  ;;  %v90_v63 = vadd.f32 %v89_v17, %v88_v44 }
  0x25   :  { %v150_v0 = vadd.f32 %v149_v47, %v148_v11  ;;  %v185_v1 = vrot.slane %v184_v48, 4  ;;  %v64_v2 = vrot.slane %v63_v54, 2  ;;  %v99_v26 = vadd.f32 %v98_v46, %v97_v45 }
  0x26   :  { %v159_v37 = vadd.f32 %v158_v49, %v157_v18  ;;  %v194_v3 = vrot.slane %v193_v55, 4  ;;  %v73_v4 = vrot.slane %v72_v56, 2  ;;  %v108_v10 = vadd.f32 %v107_v57, %v106_v21 }
  0x27   :  { %v168_v28 = vadd.f32 %v167_v50, %v166_v27  ;;  %v203_v42 = vrot.slane %v202_v53, 4  ;;  %v82_v15 = vrot.slane %v81_v58, 2  ;;  %v117_v16 = vadd.f32 %v116_v59, %v115_v33 }
  0x28   :  { %v177_v19 = vadd.f32 %v176_v60, %v175_v34  ;;  %v212_v29 = vrot.slane %v211_v61, 4  ;;  %v56_v43 = vadd.f32 %v55_v62, %v560_v41  ;;  %v91_v20 = vrot.slane %v90_v63, 2 }
  0x29   :  { %v151_v30 = vrot.slane %v150_v0, 2  ;;  %v186_v31 = vadd.f32 %v185_v1, %v184_v48  ;;  %v65_v44 = vadd.f32 %v64_v2, %v63_v54  ;;  %v100_v11 = vrot.slane %v99_v26, 2 }
  0x2a   :  { %v160_v17 = vrot.slane %v159_v37, 2  ;;  %v195_v38 = vadd.f32 %v194_v3, %v193_v55  ;;  %v74_v45 = vadd.f32 %v73_v4, %v72_v56  ;;  %v109_v18 = vrot.slane %v108_v10, 2 }
  0x2b   :  { %v169_v39 = vrot.slane %v168_v28, 2  ;;  %v204_v47 = vadd.f32 %v203_v42, %v202_v53  ;;  %v83_v21 = vadd.f32 %v82_v15, %v81_v58  ;;  %v118_v27 = vrot.slane %v117_v16, 2 }
  0x2c   :  { %v178_v51 = vrot.slane %v177_v19, 2  ;;  %v213_v52 = vadd.f32 %v212_v29, %v211_v61  ;;  %v57_v33 = vrot.slane %v56_v43, 1  ;;  %v92_v34 = vadd.f32 %v91_v20, %v90_v63 }
  0x2d   :  { %v152_v46 = vadd.f32 %v151_v30, %v150_v0  ;;  %v187_v49 = vrot.slane %v186_v31, 2  ;;  %v66_v41 = vrot.slane %v65_v44, 1  ;;  %v101_v57 = vadd.f32 %v100_v11, %v99_v26 }
  0x2e   :  { %v161_v50 = vadd.f32 %v160_v17, %v159_v37  ;;  %v196_v48 = vrot.slane %v195_v38, 2  ;;  %v75_v54 = vrot.slane %v74_v45, 1  ;;  %v110_v59 = vadd.f32 %v109_v18, %v108_v10 }
  0x2f   :  { %v170_v60 = vadd.f32 %v169_v39, %v168_v28  ;;  %v205_v55 = vrot.slane %v204_v47, 2  ;;  %v84_v56 = vrot.slane %v83_v21, 1  ;;  %v119_v62 = vadd.f32 %v118_v27, %v117_v16 }
  0x30   :  { %v179_v1 = vadd.f32 %v178_v51, %v177_v19  ;;  %v214_v53 = vrot.slane %v213_v52, 2  ;;  %v58_v58 = vadd.f32 %v57_v33, %v56_v43  ;;  %v93_v2 = vrot.slane %v92_v34, 1 }
  0x31   :  { %v153_v3 = vrot.slane %v152_v46, 1  ;;  %v188_v61 = vadd.f32 %v187_v49, %v186_v31  ;;  %v67_v4 = vadd.f32 %v66_v41, %v65_v44  ;;  %v102_v63 = vrot.slane %v101_v57, 1 }
  0x32   :  { %v162_v0 = vrot.slane %v161_v50, 1  ;;  %v197_v42 = vadd.f32 %v196_v48, %v195_v38  ;;  %v76_v15 = vadd.f32 %v75_v54, %v74_v45  ;;  %v111_v26 = vrot.slane %v110_v59, 1 }
  0x33   :  { %v171_v37 = vrot.slane %v170_v60, 1  ;;  %v206_v29 = vadd.f32 %v205_v55, %v204_v47  ;;  %v85_v20 = vadd.f32 %v84_v56, %v83_v21  ;;  %v120_v10 = vrot.slane %v119_v62, 1 }
  0x34   :  { %v180_v28 = vrot.slane %v179_v1, 1  ;;  %v215_v30 = vadd.f32 %v214_v53, %v213_v52  ;;  %v94_v11 = vadd.f32 %v93_v2, %v92_v34  ;;  %v621_v16 = vmul.f32 0.0625, %v58_v58 }
  0x35   :  { %v154_v19 = vadd.f32 %v153_v3, %v152_v46  ;;  %v189_v43 = vrot.slane %v188_v61, 1  ;;  %v103_v17 = vadd.f32 %v102_v63, %v101_v57  ;;  %v623_v18 = vmul.f32 0.0625, %v67_v4 }
  0x36   :  { %v163_v31 = vadd.f32 %v162_v0, %v161_v50  ;;  %v198_v44 = vrot.slane %v197_v42, 1  ;;  %v112_v39 = vadd.f32 %v111_v26, %v110_v59  ;;  %v625_v38 = vmul.f32 0.0625, %v76_v15 }
  0x37   :  { %v172_v45 = vadd.f32 %v171_v37, %v170_v60  ;;  %v207_v27 = vrot.slane %v206_v29, 1  ;;  %v121_v47 = vadd.f32 %v120_v10, %v119_v62  ;;  %v627_v21 = vmul.f32 0.0625, %v85_v20 }
  0x38   :  { %v181_v51 = vadd.f32 %v180_v28, %v179_v1  ;;  %v216_v52 = vrot.slane %v215_v30, 1  ;;  %v629_v33 = vmul.f32 0.0625, %v94_v11  ;;  %v190_v34 = vadd.f32 %v189_v43, %v188_v61 }
  0x39   :  { %v218_v46 = vmul.f32 0.0625, %v154_v19  ;;  %v226_v49 = vmul.f32 %v621_v16, %v621_v16  ;;  %v633_v41 = vmul.f32 0.0625, %v103_v17  ;;  %v199_v57 = vadd.f32 %v198_v44, %v197_v42 }
  0x3a   :  { %v219_v50 = vmul.f32 0.0625, %v163_v31  ;;  %v227_v48 = vmul.f32 %v623_v18, %v623_v18  ;;  %v637_v54 = vmul.f32 0.0625, %v112_v39  ;;  %v208_v59 = vadd.f32 %v207_v27, %v206_v29 }
  0x3b   :  { %v220_v60 = vmul.f32 0.0625, %v172_v45  ;;  %v228_v55 = vmul.f32 %v625_v38, %v625_v38  ;;  %v641_v56 = vmul.f32 0.0625, %v121_v47  ;;  %v217_v62 = vadd.f32 %v216_v52, %v215_v30 }
  0x3c   :  { %v221_v1 = vmul.f32 0.0625, %v181_v51  ;;  %v229_v53 = vmul.f32 %v627_v21, %v627_v21  ;;  %v222_v58 = vmul.f32 0.0625, %v190_v34  ;;  %v230_v2 = vmul.f32 %v629_v33, %v629_v33 }
  0x3d   :  { %v234_v3 = vsub.f32 %v218_v46, %v226_v49  ;;  %v223_v61 = vmul.f32 0.0625, %v199_v57  ;;  %v231_v4 = vmul.f32 %v633_v41, %v633_v41  ;;  %v235_v63 = vsub.f32 %v219_v50, %v227_v48 }
  0x3e   :  { %v224_v0 = vmul.f32 0.0625, %v208_v59  ;;  %v232_v42 = vmul.f32 %v637_v54, %v637_v54  ;;  %v236_v15 = vsub.f32 %v220_v60, %v228_v55  ;;  %v225_v26 = vmul.f32 0.0625, %v217_v62 }
  0x3f   :  { %v233_v37 = vmul.f32 %v641_v56, %v641_v56  ;;  %v237_v29 = vsub.f32 %v221_v1, %v229_v53  ;;  %v238_v20 = vsub.f32 %v222_v58, %v230_v2  ;;  %v242_v10 = vmax.f32 %v234_v3, 0.0 }
  0x40   :  { %v239_v28 = vsub.f32 %v223_v61, %v231_v4  ;;  %v243_v30 = vmax.f32 %v235_v63, 0.0  ;;  %v240_v11 = vsub.f32 %v224_v0, %v232_v42  ;;  %v244_v19 = vmax.f32 %v236_v15, 0.0 }
  0x41   :  { %v241_v43 = vsub.f32 %v225_v26, %v233_v37  ;;  %v245_v17 = vmax.f32 %v237_v29, 0.0  ;;  %v246_v31 = vmax.f32 %v238_v20, 0.0  ;;  %v250_v44 = vadd.f32 1e-05, %v242_v10 }
  0x42   :  { %v247_v39 = vmax.f32 %v239_v28, 0.0  ;;  %v251_v45 = vadd.f32 1e-05, %v243_v30  ;;  %v248_v27 = vmax.f32 %v240_v11, 0.0  ;;  %v252_v47 = vadd.f32 1e-05, %v244_v19 }
  0x43   :  { %v249_v51 = vmax.f32 %v241_v43, 0.0  ;;  %v253_v52 = vadd.f32 1e-05, %v245_v17  ;;  %v254_v34 = vadd.f32 1e-05, %v246_v31  ;;  %390 = vrsqrt.f32 %v250_v44 }
  0x44   :  { %v255_v46 = vadd.f32 1e-05, %v247_v39  ;;  %392 = vrsqrt.f32 %v251_v45  ;;  %v256_v49 = vadd.f32 1e-05, %v248_v27  ;;  %v266_v1 = vsub.f32 %v493_v5, %v621_v16 }
  0x45   :  { %394 = vrsqrt.f32 %v252_v47  ;;  %v257_v57 = vadd.f32 1e-05, %v249_v51  ;;  %v268_v53 = vsub.f32 %v497_v7, %v623_v18  ;;  %v270_v58 = vsub.f32 %v501_v9, %v625_v38 }
  0x46   :  { %396 = vrsqrt.f32 %v253_v52  ;;  %v272_v2 = vsub.f32 %v509_v13, %v627_v21  ;;  %v274_v61 = vsub.f32 %v525_v22, %v629_v33  ;;  %v276_v4 = vsub.f32 %v529_v24, %v633_v41 }
  0x47   :  { %398 = vrsqrt.f32 %v254_v34  ;;  %v278_v63 = vsub.f32 %v543_v32, %v637_v54  ;;  %v280_v5 = vsub.f32 %v551_v36, %v641_v56  ;;  %v267_v9 = vsub.f32 %v495_v6, %v621_v16 }
  0x48   :  { %400 = vrsqrt.f32 %v255_v46  ;;  %v269_v13 = vsub.f32 %v499_v8, %v623_v18  ;;  %v271_v0 = vsub.f32 %v507_v12, %v625_v38  ;;  %v273_v22 = vsub.f32 %v511_v14, %v627_v21 }
  0x49   :  { %402 = vrsqrt.f32 %v256_v49  ;;  %v275_v24 = vsub.f32 %v527_v23, %v629_v33  ;;  %v277_v32 = vsub.f32 %v531_v25, %v633_v41  ;;  %v279_v36 = vsub.f32 %v549_v35, %v637_v54 }
  0x4a   :  { %404 = vrsqrt.f32 %v257_v57  ;;  %v281_v6 = vsub.f32 %v558_v40, %v641_v56 }
  0x50   :  { %v391_v50 = vpop.eup %390 }
  0x51   :  { %v393_v48 = vpop.eup %392  ;;  %v282_v16 = vmul.f32 %v391_v50, %v266_v1  ;;  %v283_v21 = vmul.f32 %v391_v50, %v267_v9 }
  0x52   :  { %v395_v59 = vpop.eup %394  ;;  %v284_v8 = vmul.f32 %v393_v48, %v268_v53  ;;  %v285_v26 = vmul.f32 %v393_v48, %v269_v13 }
  0x53   :  { %v397_v60 = vpop.eup %396  ;;  %v286_v18 = vmul.f32 %v395_v59, %v270_v58  ;;  %v287_v23 = vmul.f32 %v395_v59, %v271_v0 }
  0x54   :  { %v399_v55 = vpop.eup %398  ;;  %v288_v42 = vmul.f32 %v397_v60, %v272_v2  ;;  %v289_v33 = vmul.f32 %v397_v60, %v273_v22 }
  0x55   :  { %v401_v62 = vpop.eup %400  ;;  %v290_v12 = vmul.f32 %v399_v55, %v274_v61  ;;  %v291_v41 = vmul.f32 %v399_v55, %v275_v24 }
  0x56   :  { %v403_v3 = vpop.eup %402  ;;  %v292_v38 = vmul.f32 %v401_v62, %v276_v4  ;;  %v293_v29 = vmul.f32 %v401_v62, %v277_v32 }
  0x57   :  { %v405_v7 = vpop.eup %404  ;;  %v294_v15 = vmul.f32 %v403_v3, %v278_v63  ;;  %v295_v35 = vmul.f32 %v403_v3, %v279_v36 }
  0x58   :  { %v296_v14 = vmul.f32 %v405_v7, %v280_v5  ;;  %v297_v54 = vmul.f32 %v405_v7, %v281_v6 }
  0x8b   :  { %v327_v37 = vpop.permute.xlu1 %326  ;;  %v301_v25 = vpop.permute.xlu0 %300 }
  0x8c   :  { %v308_v20 = vmul.f32 %v301_v25, %v282_v16  ;;  %v310_v40 = vmul.f32 %v301_v25, %v284_v8  ;;  %v312_v56 = vmul.f32 %v301_v25, %v286_v18  ;;  %v314_v10 = vmul.f32 %v301_v25, %v288_v42 }
  0x8d   :  { %v316_v28 = vmul.f32 %v301_v25, %v290_v12  ;;  %v318_v30 = vmul.f32 %v301_v25, %v292_v38  ;;  %v320_v11 = vmul.f32 %v301_v25, %v294_v15  ;;  %v322_v19 = vmul.f32 %v301_v25, %v296_v14 }
  0x8e   :  { %v334_v43 = vadd.f32 %v327_v37, %v308_v20  ;;  %v336_v17 = vadd.f32 %v327_v37, %v310_v40  ;;  %v338_v31 = vadd.f32 %v327_v37, %v312_v56  ;;  %v340_v44 = vadd.f32 %v327_v37, %v314_v10 }
  0x8f   :  { %v342_v39 = vadd.f32 %v327_v37, %v316_v28  ;;  %v344_v45 = vadd.f32 %v327_v37, %v318_v30  ;;  %v346_v27 = vadd.f32 %v327_v37, %v320_v11  ;;  %v348_v47 = vadd.f32 %v327_v37, %v322_v19  ;;  %v306_v51 = vpop.permute.xlu0 %305  ;;  %v332_v57 = vpop.permute.xlu1 %331 }
  0x90   :  { %350 = vst.msk [vmem:[#allocation5] sm:$0xff] %vm49_vm0, %v334_v43  ;;  %352 = vst.msk [vmem:[#allocation5 + $0x10] sm:$0xff] %vm49_vm0, %v336_v17  ;;  %v309_v52 = vmul.f32 %v306_v51, %v283_v21  ;;  %v311_v34 = vmul.f32 %v306_v51, %v285_v26  ;;  %v313_v46 = vmul.f32 %v306_v51, %v287_v23 }
  0x91   :  { %354 = vst.msk [vmem:[#allocation5 + $0x20] sm:$0xff] %vm49_vm0, %v338_v31  ;;  %356 = vst.msk [vmem:[#allocation5 + $0x30] sm:$0xff] %vm49_vm0, %v340_v44  ;;  %v315_v49 = vmul.f32 %v306_v51, %v289_v33  ;;  %v317_v50 = vmul.f32 %v306_v51, %v291_v41  ;;  %v319_v48 = vmul.f32 %v306_v51, %v293_v29 }
  0x92   :  { %358 = vst.msk [vmem:[#allocation5 + $0x40] sm:$0xff] %vm49_vm0, %v342_v39  ;;  %360 = vst.msk [vmem:[#allocation5 + $0x50] sm:$0xff] %vm49_vm0, %v344_v45  ;;  %v321_v59 = vmul.f32 %v306_v51, %v295_v35  ;;  %v323_v60 = vmul.f32 %v306_v51, %v297_v54  ;;  %v335_v55 = vadd.f32 %v332_v57, %v309_v52 }
  0x93   :  { %362 = vst.msk [vmem:[#allocation5 + $0x60] sm:$0xff] %vm49_vm0, %v346_v27  ;;  %364 = vst.msk [vmem:[#allocation5 + $0x70] sm:$0xff] %vm49_vm0, %v348_v47  ;;  %v337_v62 = vadd.f32 %v332_v57, %v311_v34  ;;  %v339_v1 = vadd.f32 %v332_v57, %v313_v46  ;;  %v341_v53 = vadd.f32 %v332_v57, %v315_v49 }
  0x94   :  { %v343_v58 = vadd.f32 %v332_v57, %v317_v50  ;;  %v345_v2 = vadd.f32 %v332_v57, %v319_v48  ;;  %v347_v3 = vadd.f32 %v332_v57, %v321_v59  ;;  %v349_v61 = vadd.f32 %v332_v57, %v323_v60  ;;  %351 = vst.msk [vmem:[#allocation5 + $0x8] sm:$0xff] %vm49_vm0, %v335_v55 }
  0x95   :  { %353 = vst.msk [vmem:[#allocation5 + $0x18] sm:$0xff] %vm49_vm0, %v337_v62  ;;  %355 = vst.msk [vmem:[#allocation5 + $0x28] sm:$0xff] %vm49_vm0, %v339_v1 }
  0x96   :  { %357 = vst.msk [vmem:[#allocation5 + $0x38] sm:$0xff] %vm49_vm0, %v341_v53  ;;  %359 = vst.msk [vmem:[#allocation5 + $0x48] sm:$0xff] %vm49_vm0, %v343_v58 }
  0x97   :  { %361 = vst.msk [vmem:[#allocation5 + $0x58] sm:$0xff] %vm49_vm0, %v345_v2  ;;  %363 = vst.msk [vmem:[#allocation5 + $0x68] sm:$0xff] %vm49_vm0, %v347_v3 }
  0x98   :  { %365 = vst.msk [vmem:[#allocation5 + $0x78] sm:$0xff] %vm49_vm0, %v349_v61 }
  0x99   :  { %437 = shalt.err (!%p434_p9)
}
  0x9a   :  { %377 = dma.vmem_to_hbm [thread:$0]  %s372_s2, 2048, %s710_s3, [#allocation4], %s451_s15, %s451_s15, %s452_s16  }
  0x9b   :  { %448 = dma.done.wait [#allocation4], 2048  }
  0x9c   :  { %449 = vsyncadd [#allocation4], 4294965248 }
  0x9d   :  { %381 = vsyncpa [#allocation3], 1 }
  0x9e   :  { %382 = vsyncpa [#allocation4], 1 }

</bundles_post_ra>
